<compile_context>
chip_gen: v6e
topology: v6e:2x2x1
jax: 0.10.0
libtpu: 0.0.40
codegen_flags: <defaults>
</compile_context>

<pallas_src>
import functools

import jax
import jax.numpy as jnp
from jax.experimental import pallas as pl
from jax.experimental.pallas import tpu as pltpu


def _round_up(a, b):
    return ((a + b - 1) // b) * b


def _cdiv(a, b):
    return -(-a // b)


def _detect_vmem_capacity_bytes():
    """Best-effort VMEM capacity; conservative 64 MiB (v7x per-core) default."""
    cap = 64 * 1024 * 1024
    try:
        info = pltpu.get_tpu_info()
        v = getattr(info, "vmem_capacity_bytes", None)
        if v:
            cap = int(v)
    except Exception:
        pass
    return cap


def _detect_num_tensorcores():
    """Best-effort TensorCore count (v7x megacore); default 1 (v5e/v6e)."""
    try:
        info = pltpu.get_tpu_info()
        for attr in ("num_cores", "core_count", "num_tensorcores"):
            v = getattr(info, attr, None)
            if isinstance(v, int) and v > 0:
                return v
    except Exception:
        pass
    return 1


def _cdist_t_kernel(c2x_ref, c2_ref, x_ref, o_ref, *, squared):
    # c2x_ref: (K, D)  = 2 * coords      (resident across all grid steps)
    # c2_ref : (K, 1)  = ||coords||^2    (resident)
    # x_ref  : (TM, D) tile of points
    # o_ref  : (K, TM) tile of pairwise distances, transposed & lane-dense.
    x = x_ref[...].astype(jnp.float32)                       # (TM, D)
    xt = x.T                                                  # (D, TM), XLU
    # ||x||^2 on the MXU (idle at K=8) instead of an XLU sublane reduce.
    x2 = jnp.dot(jnp.ones((1, xt.shape[0]), jnp.float32), xt * xt,
                 preferred_element_type=jnp.float32)          # (1, TM)
    # MXU cross term: (2C) @ X^T -> (K, TM)
    xc = jnp.dot(c2x_ref[...], xt, preferred_element_type=jnp.float32)
    # ||x||^2 + ||c||^2 - 2 x.c ; clamp fp cancellation error at 0.
    d2 = jnp.maximum(x2 + c2_ref[...] - xc, 0.0)              # (K, TM)
    if squared:
        o_ref[...] = d2.astype(o_ref.dtype)
    else:
        o_ref[...] = jnp.sqrt(d2).astype(o_ref.dtype)


@functools.partial(jax.jit,
                   static_argnames=("tm", "squared", "transposed_output"))
def centroid_pool_forward(x, coords, *, tm=None, squared=False,
                          transposed_output=False):
    """Pallas equivalent of CentroidPool.forward: torch.cdist(X, coords).

    Returns (N, K) f32 distances (or (K, N) if transposed_output=True).
    """
    n, d = x.shape
    k, d_c = coords.shape
    assert d == d_c, "feature dims must match"

    # ---- VMEM-budgeted tile selection (lane padding of X tiles accounted) ----
    vmem_cap = _detect_vmem_capacity_bytes()
    vmem_budget = int(vmem_cap * 0.7)
    d_lanes = _round_up(d, 128)        # (tm, d) VMEM block is lane-padded
    k_rows = max(k, 8)

    def vmem_estimate(tm_):
        x_blocks = 2 * tm_ * d_lanes * 4      # double-buffered X input tiles
        x_temp = tm_ * d_lanes * 4            # f32 upcast of the tile
        xt_temps = 2 * d * tm_ * 4            # x^T and x^T*x^T (lane-dense)
        o_blocks = 2 * k_rows * tm_ * 4       # double-buffered (K, TM) output
        epilogue = 3 * k_rows * tm_ * 4       # xc / d2 / sqrt temporaries
        return x_blocks + x_temp + xt_temps + o_blocks + epilogue + (1 << 20)

    tm_target = 16384 if tm is None else max(_round_up(tm, 128), 128)
    while tm_target > 512 and vmem_estimate(tm_target) > vmem_budget:
        tm_target //= 2
    tm_target = max(_round_up(tm_target, 128), 128)

    # ---- load-balanced grid; no forced split on single-TC chips ----
    n_pad128 = _round_up(max(n, 1), 128)
    n_steps = _cdiv(n_pad128, tm_target)
    cores = _detect_num_tensorcores()
    if cores > 1 and n_pad128 >= cores * 2048:
        n_steps = _round_up(n_steps, cores)   # give every TensorCore work
    tm_eff = _round_up(_cdiv(n_pad128, n_steps), 128)
    n_steps = _cdiv(n_pad128, tm_eff)
    n_padded = tm_eff * n_steps

    if n_padded != n:
        x = jnp.pad(x, ((0, n_padded - n), (0, 0)))

    # ---- grid-invariant centroid prep (hoisted out of the kernel body) ----
    coords_f32 = coords.astype(jnp.float32)
    c2x = 2.0 * coords_f32                                           # (K, D)
    c2 = jnp.sum(coords_f32 * coords_f32, axis=-1, keepdims=True)    # (K, 1)

    cost = pl.CostEstimate(
        flops=2 * n_padded * k * d + 2 * n_padded * d + 5 * n_padded * k,
        transcendentals=0 if squared else n_padded * k,
        bytes_accessed=(n_padded * d * x.dtype.itemsize
                        + n_padded * k * 4 + k * (d + 1) * 4),
    )

    out_t = pl.pallas_call(
        functools.partial(_cdist_t_kernel, squared=squared),
        out_shape=jax.ShapeDtypeStruct((k, n_padded), jnp.float32),
        grid=(n_steps,),
        in_specs=[
            pl.BlockSpec((k, d), lambda i: (0, 0)),       # 2*coords, resident
            pl.BlockSpec((k, 1), lambda i: (0, 0)),       # ||coords||^2, resident
            pl.BlockSpec((tm_eff, d), lambda i: (i, 0)),  # X row tile
        ],
        out_specs=pl.BlockSpec((k, tm_eff), lambda i: (0, i)),
        compiler_params=pltpu.CompilerParams(
            dimension_semantics=("parallel",),
            vmem_limit_bytes=vmem_budget),
        cost_estimate=cost,
    )(c2x, c2, x)

    out_t = out_t[:, :n]
    if transposed_output:
        return out_t          # (K, N) lane-dense, zero extra HBM traffic
    # (K, N) -> (N, K): layout plumbing only (see analysis at top of file).
    return out_t.T


class CentroidPool:
    """JAX/Pallas port of the PyTorch CentroidPool module (forward only)."""

    # TODO(synk): nn.Parameter autograd/training state not modeled; forward only.
    def __init__(self, n_clusts, n_dims, key):
        self.n_clusts = n_clusts
        self.n_dims = n_dims
        # torch.rand -> uniform [0, 1); deterministic synthetic init.
        self.coords = jax.random.uniform(
            key, (n_clusts, n_dims), dtype=jnp.float32)

    def __call__(self, x):
        return centroid_pool_forward(x, self.coords)


def _reference_cdist(x, coords):
    return jnp.sqrt(
        jnp.sum((x[:, None, :].astype(jnp.float32)
                 - coords[None, :, :].astype(jnp.float32)) ** 2, axis=-1))


if __name__ == "__main__":
    key = jax.random.PRNGKey(0)
    k_coords, k_x1, k_x2 = jax.random.split(key, 3)

    n_clusts, n_dims = 8, 32
    pool = CentroidPool(n_clusts, n_dims, k_coords)

    # Case 1: small N, NOT a multiple of 128 -> exercises padding, grid=1.
    n_points = 200
    x1 = jax.random.normal(k_x1, (n_points, n_dims), dtype=jnp.float32)
    d1 = jax.block_until_ready(pool(x1))
    ref1 = _reference_cdist(x1, pool.coords)
    assert d1.shape == (n_points, n_clusts), d1.shape
    assert jnp.allclose(d1, ref1, atol=1e-4, rtol=1e-4), \
        float(jnp.max(jnp.abs(d1 - ref1)))

    # Case 2: force a small tile so the multi-step (grid > 1) path is exercised.
    n_points2 = 600
    x2 = jax.random.normal(k_x2, (n_points2, n_dims), dtype=jnp.float32)
    d2 = jax.block_until_ready(
        centroid_pool_forward(x2, pool.coords, tm=256))
    ref2 = _reference_cdist(x2, pool.coords)
    assert d2.shape == (n_points2, n_clusts), d2.shape
    assert jnp.allclose(d2, ref2, atol=1e-4, rtol=1e-4), \
        float(jnp.max(jnp.abs(d2 - ref2)))

    print("KERNEL_OK")
</pallas_src>

<mosaic_0001>
module attributes {stable_mosaic.version = 11 : i64} {
  func.func @_cdist_t_kernel(%arg0: i32, %arg1: memref<8x32xf32, #tpu.memory_space<vmem>>, %arg2: memref<8x1xf32, #tpu.memory_space<vmem>>, %arg3: memref<256x32xf32, #tpu.memory_space<vmem>>, %arg4: memref<8x256xf32, #tpu.memory_space<vmem>>) attributes {dimension_semantics = [#tpu.dimension_semantics<parallel>], iteration_bounds = array<i64: 1>, scalar_prefetch = 0 : i64, scratch_operands = 0 : i64, tpu.core_type = #tpu.core_type<tc>, window_params = [{pipeline_mode = #tpu.pipeline_mode<synchronous>, transform_indices = @transform_0, window_bounds = array<i64: 8, 32>}, {pipeline_mode = #tpu.pipeline_mode<synchronous>, transform_indices = @transform_1, window_bounds = array<i64: 8, 1>}, {transform_indices = @transform_2, window_bounds = array<i64: 256, 32>}, {transform_indices = @transform_3, window_bounds = array<i64: 8, 256>}]} {
    %c0 = arith.constant 0 : index
    %c0_0 = arith.constant 0 : index
    %0 = vector.load %arg3[%c0, %c0_0] : memref<256x32xf32, #tpu.memory_space<vmem>>, vector<256x32xf32>
    %1 = tpu.transpose %0, [1, 0] : vector<256x32xf32> -> vector<32x256xf32>
    %cst = arith.constant 1.000000e+00 : f32
    %2 = vector.broadcast %cst : f32 to vector<1x32xf32>
    %3 = arith.mulf %1, %1 : vector<32x256xf32>
    %cst_1 = arith.constant dense<0.000000e+00> : vector<1x256xf32>
    %4 = tpu.matmul %2, %3, %cst_1 {dimension_numbers = #tpu.dot_dimension_numbers<[1], [0], [0], [1], [0, 0, 1, 1], [], []>} : vector<1x32xf32>, vector<32x256xf32>, vector<1x256xf32> -> vector<1x256xf32>
    %c0_2 = arith.constant 0 : index
    %c0_3 = arith.constant 0 : index
    %5 = vector.load %arg1[%c0_2, %c0_3] : memref<8x32xf32, #tpu.memory_space<vmem>>, vector<8x32xf32>
    %cst_4 = arith.constant dense<0.000000e+00> : vector<8x256xf32>
    %6 = tpu.matmul %5, %1, %cst_4 {dimension_numbers = #tpu.dot_dimension_numbers<[1], [0], [0], [1], [0, 0, 1, 1], [], []>} : vector<8x32xf32>, vector<32x256xf32>, vector<8x256xf32> -> vector<8x256xf32>
    %c0_5 = arith.constant 0 : index
    %c0_6 = arith.constant 0 : index
    %7 = vector.load %arg2[%c0_5, %c0_6] : memref<8x1xf32, #tpu.memory_space<vmem>>, vector<8x1xf32>
    %8 = vector.broadcast %4 : vector<1x256xf32> to vector<8x256xf32>
    %9 = vector.broadcast %7 : vector<8x1xf32> to vector<8x256xf32>
    %10 = arith.addf %8, %9 : vector<8x256xf32>
    %11 = arith.subf %10, %6 : vector<8x256xf32>
    %cst_7 = arith.constant 0.000000e+00 : f32
    %12 = vector.broadcast %cst_7 : f32 to vector<8x256xf32>
    %13 = arith.maximumf %11, %12 : vector<8x256xf32>
    %14 = math.sqrt %13 : vector<8x256xf32>
    %c0_8 = arith.constant 0 : index
    %c0_9 = arith.constant 0 : index
    %15 = vector.load %arg4[%c0_8, %c0_9] : memref<8x256xf32, #tpu.memory_space<vmem>>, vector<8x256xf32>
    tpu.vector_store %arg4[%c0_8, %c0_9], %14 {strides = array<i32>} : memref<8x256xf32, #tpu.memory_space<vmem>>, vector<8x256xf32>,
    return
  }
  func.func @transform_0(%arg0: i32) -> (i32, i32) {
    %c0_i32 = arith.constant 0 : i32
    %c0_i32_0 = arith.constant 0 : i32
    %c0_i32_1 = arith.constant 0 : i32
    return %c0_i32, %c0_i32_0 : i32, i32
  }
  func.func @transform_1(%arg0: i32) -> (i32, i32) {
    %c0_i32 = arith.constant 0 : i32
    %c0_i32_0 = arith.constant 0 : i32
    %c0_i32_1 = arith.constant 0 : i32
    return %c0_i32, %c0_i32_0 : i32, i32
  }
  func.func @transform_2(%arg0: i32) -> (i32, i32) {
    %c0_i32 = arith.constant 0 : i32
    %c0_i32_0 = arith.constant 0 : i32
    return %arg0, %c0_i32 : i32, i32
  }
  func.func @transform_3(%arg0: i32) -> (i32, i32) {
    %c0_i32 = arith.constant 0 : i32
    %c0_i32_0 = arith.constant 0 : i32
    return %c0_i32, %arg0 : i32, i32
  }
}

</mosaic_0001>

<bundles_post_ra>
// kernel: centroid_pool_forward.1
= control target key start
LH: loop header
LB: loop body
LE: loop exit
PB: predicated region body
PF: predicated region fallthrough
CT: control target
= control target key end

     0   :  { %v318_v12 = vmov 0.0   ;;  %v319_v34 = vmov 0   ;;  %vm118_vm0 = vcmask 261120   ;;  %v320_v52 = vmov 1.0   ;;  %s449_s2 = inlined_call_operand.vmem [shape: f32[256,32], index: 2, kind: input, shape index: {}]   ;;  %s450_s1 = inlined_call_operand.vmem [shape: f32[8,1], index: 1, kind: input, shape index: {}]   ;;  %s451_s0 = inlined_call_operand.vmem [shape: f32[8,32], index: 0, kind: input, shape index: {}]   ;;  %s452_s3 = inlined_call_operand.vmem [shape: f32[8,256], index: 3, kind: output, shape index: {}]  }
   0x1   :  { %v30_v0 = vld [vmem:[%s449_s2 + $0x80] sm:$0xff]  ;;  %v31_v2 = vld [vmem:[%s449_s2 + $0x88] sm:$0xff]  ;;  %v32_v4 = vld [vmem:[%s449_s2 + $0x90] sm:$0xff]  ;;  %186 = vmatprep.mubr.f32.mxu0 %v318_v12  ;;  %261 = vmatprep.mubr.f32.mxu1 %v318_v12  ;;  %v269_v53 = vlaneseq }
   0x2   :  { %v14_v1 = vld [vmem:[%s449_s2] sm:$0xff]  ;;  %78 = vxpose.xlu0.b32.start [1/16] (narrow) %v30_v0, 32  ;;  %v15_v3 = vld [vmem:[%s449_s2 + $0x8] sm:$0xff]  ;;  %v16_v5 = vld [vmem:[%s449_s2 + $0x10] sm:$0xff] }
   0x3   :  { %46 = vxpose.xlu1.b32.start [1/16] (narrow) %v14_v1, 32  ;;  %v33_v6 = vld [vmem:[%s449_s2 + $0x98] sm:$0xff]  ;;  %v34_v8 = vld [vmem:[%s449_s2 + $0xa0] sm:$0xff]  ;;  %v35_v10 = vld [vmem:[%s449_s2 + $0xa8] sm:$0xff]  ;;  %v270_v54 = vshrl.u32 %v269_v53, 7 }
   0x4   :  { %v17_v7 = vld [vmem:[%s449_s2 + $0x18] sm:$0xff]  ;;  %v18_v9 = vld [vmem:[%s449_s2 + $0x20] sm:$0xff]  ;;  %v19_v11 = vld [vmem:[%s449_s2 + $0x28] sm:$0xff] }
   0x5   :  { %v36_v13 = vld [vmem:[%s449_s2 + $0xb0] sm:$0xff]  ;;  %v37_v15 = vld [vmem:[%s449_s2 + $0xb8] sm:$0xff]  ;;  %v38_v17 = vld [vmem:[%s449_s2 + $0xc0] sm:$0xff]  ;;  %v271_v55 = vsub.s32 0, %v270_v54 }
   0x6   :  { %79 = vxpose.xlu0.b32.cont [2/16] (narrow) %v31_v2, 32  ;;  %v20_v14 = vld [vmem:[%s449_s2 + $0x30] sm:$0xff]  ;;  %v21_v16 = vld [vmem:[%s449_s2 + $0x38] sm:$0xff]  ;;  %v22_v18 = vld [vmem:[%s449_s2 + $0x40] sm:$0xff] }
   0x7   :  { %47 = vxpose.xlu1.b32.cont [2/16] (narrow) %v15_v3, 32  ;;  %v39_v19 = vld [vmem:[%s449_s2 + $0xc8] sm:$0xff]  ;;  %v40_v21 = vld [vmem:[%s449_s2 + $0xd0] sm:$0xff]  ;;  %v41_v23 = vld [vmem:[%s449_s2 + $0xd8] sm:$0xff] }
   0x8   :  { %v23_v20 = vld [vmem:[%s449_s2 + $0x48] sm:$0xff]  ;;  %v24_v22 = vld [vmem:[%s449_s2 + $0x50] sm:$0xff]  ;;  %v25_v24 = vld [vmem:[%s449_s2 + $0x58] sm:$0xff] }
   0x9   :  { %v42_v25 = vld [vmem:[%s449_s2 + $0xe0] sm:$0xff]  ;;  %v43_v27 = vld [vmem:[%s449_s2 + $0xe8] sm:$0xff]  ;;  %v44_v29 = vld [vmem:[%s449_s2 + $0xf0] sm:$0xff] }
   0xa   :  { %80 = vxpose.xlu0.b32.cont [3/16] (narrow) %v32_v4, 32  ;;  %v26_v26 = vld [vmem:[%s449_s2 + $0x60] sm:$0xff]  ;;  %v27_v28 = vld [vmem:[%s449_s2 + $0x68] sm:$0xff]  ;;  %v28_v30 = vld [vmem:[%s449_s2 + $0x70] sm:$0xff] }
   0xb   :  { %48 = vxpose.xlu1.b32.cont [3/16] (narrow) %v16_v5, 32  ;;  %v45_v31 = vld [vmem:[%s449_s2 + $0xf8] sm:$0xff]  ;;  %v268_v33 = vld [vmem:[%s450_s1] sm:$0xff] }
   0xc   :  { %v29_v32 = vld [vmem:[%s449_s2 + $0x78] sm:$0xff]  ;;  %v193_v49 = vld [vmem:[%s451_s0] sm:$0xff] }
   0xe   :  { %81 = vxpose.xlu0.b32.cont [4/16] (narrow) %v33_v6, 32 }
   0xf   :  { %49 = vxpose.xlu1.b32.cont [4/16] (narrow) %v17_v7, 32 }
  0x12   :  { %82 = vxpose.xlu0.b32.cont [5/16] (narrow) %v34_v8, 32 }
  0x13   :  { %50 = vxpose.xlu1.b32.cont [5/16] (narrow) %v18_v9, 32 }
  0x16   :  { %83 = vxpose.xlu0.b32.cont [6/16] (narrow) %v35_v10, 32 }
  0x17   :  { %51 = vxpose.xlu1.b32.cont [6/16] (narrow) %v19_v11, 32 }
  0x1a   :  { %84 = vxpose.xlu0.b32.cont [7/16] (narrow) %v36_v13, 32 }
  0x1b   :  { %52 = vxpose.xlu1.b32.cont [7/16] (narrow) %v20_v14, 32 }
  0x1e   :  { %85 = vxpose.xlu0.b32.cont [8/16] (narrow) %v37_v15, 32 }
  0x1f   :  { %53 = vxpose.xlu1.b32.cont [8/16] (narrow) %v21_v16, 32 }
  0x22   :  { %86 = vxpose.xlu0.b32.cont [9/16] (narrow) %v38_v17, 32 }
  0x23   :  { %54 = vxpose.xlu1.b32.cont [9/16] (narrow) %v22_v18, 32 }
  0x26   :  { %87 = vxpose.xlu0.b32.cont [10/16] (narrow) %v39_v19, 32 }
  0x27   :  { %55 = vxpose.xlu1.b32.cont [10/16] (narrow) %v23_v20, 32 }
  0x2a   :  { %88 = vxpose.xlu0.b32.cont [11/16] (narrow) %v40_v21, 32 }
  0x2b   :  { %56 = vxpose.xlu1.b32.cont [11/16] (narrow) %v24_v22, 32 }
  0x2e   :  { %89 = vxpose.xlu0.b32.cont [12/16] (narrow) %v41_v23, 32 }
  0x2f   :  { %57 = vxpose.xlu1.b32.cont [12/16] (narrow) %v25_v24, 32 }
  0x32   :  { %90 = vxpose.xlu0.b32.cont [13/16] (narrow) %v42_v25, 32 }
  0x33   :  { %58 = vxpose.xlu1.b32.cont [13/16] (narrow) %v26_v26, 32 }
  0x36   :  { %91 = vxpose.xlu0.b32.cont [14/16] (narrow) %v43_v27, 32 }
  0x37   :  { %59 = vxpose.xlu1.b32.cont [14/16] (narrow) %v27_v28, 32 }
  0x3a   :  { %92 = vxpose.xlu0.b32.cont [15/16] (narrow) %v44_v29, 32 }
  0x3b   :  { %60 = vxpose.xlu1.b32.cont [15/16] (narrow) %v28_v30, 32 }
  0x3e   :  { %93 = vxpose.xlu0.b32.end [16/16] (narrow) %v45_v31, 32 }
  0x3f   :  { %61 = vxpose.xlu1.b32.end [16/16] (narrow) %v29_v32, 32 }
  0x67   :  { %313 = vset.pattern.permute.xlu0 %v319_v34 }
  0x68   :  { %279 = vperm.xlu0 %313, %v268_v33  }
  0x7e   :  { %v94_v35 = vpop.trf.xlu0 }
  0x7f   :  { %v62_v36 = vpop.trf.xlu1  ;;  %v111_v50 = vmul.f32 %v94_v35, %v94_v35 }
  0x80   :  { %v110_v51 = vmul.f32 %v62_v36, %v62_v36 }
  0x82   :  { %v95_v37 = vpop.trf.xlu0 }
  0x83   :  { %v63_v38 = vpop.trf.xlu1  ;;  %v113_v47 = vmul.f32 %v95_v37, %v95_v37 }
  0x84   :  { %v112_v48 = vmul.f32 %v63_v38, %v63_v38 }
  0x86   :  { %v96_v39 = vpop.trf.xlu0 }
  0x87   :  { %v64_v40 = vpop.trf.xlu1  ;;  %v115_v45 = vmul.f32 %v96_v39, %v96_v39 }
  0x88   :  { %v114_v46 = vmul.f32 %v64_v40, %v64_v40 }
  0x8a   :  { %v97_v41 = vpop.trf.xlu0 }
  0x8b   :  { %v65_v42 = vpop.trf.xlu1  ;;  %221 = vmatprep.subr.mxu1 %v97_v41  ;;  %v117_v44 = vmul.f32 %v97_v41, %v97_v41 }
  0x8c   :  { %v116_v43 = vmul.f32 %v65_v42, %v65_v42  ;;  %222 = vmatpush1.msra.mxu1 %v65_v42 }
  0x8d   :  { %146 = vmatprep.subr.mxu0 %v117_v44  ;;  %223 = vmatprep.subr.mxu1 %v96_v39 }
  0x8e   :  { %147 = vmatpush1.msra.mxu0 %v116_v43  ;;  %224 = vmatpush1.msra.mxu1 %v64_v40 }
  0x8f   :  { %148 = vmatprep.subr.mxu0 %v115_v45  ;;  %225 = vmatprep.subr.mxu1 %v95_v37 }
  0x90   :  { %149 = vmatpush1.msra.mxu0 %v114_v46  ;;  %226 = vmatpush1.msra.mxu1 %v63_v38 }
  0x91   :  { %150 = vmatprep.subr.mxu0 %v113_v47  ;;  %227 = vmatprep.subr.mxu1 %v94_v35 }
  0x92   :  { %151 = vmatpush1.msra.mxu0 %v112_v48  ;;  %228 = vmatpush1.msra.mxu1 %v62_v36 }
  0x93   :  { %152 = vmatprep.subr.mxu0 %v111_v50  ;;  %309 = vmatmul.mubr.msk.f32.vlgmr.msra.gmra.mxu1 %vm118_vm0, %v193_v49 }
  0x94   :  { %153 = vmatpush1.msra.mxu0 %v110_v51 }
  0x95   :  { %308 = vmatmul.mubr.msk.f32.vlgmr.msra.gmra.mxu0 %vm118_vm0, %v320_v52 }
  0xe3   :  { %v280_v57 = vpop.permute.xlu0 %279 }
 0x153   :  { %v263_v60 = vpop.f32.mrf.mxu1 }
 0x155   :  { %v188_v56 = vpop.f32.mrf.mxu0  ;;  %v265_v1 = vpop.f32.mrf.mxu1 }
 0x156   :  { %v272_v58 = vrot.slane %v188_v56, %v271_v55 }
 0x157   :  { %v190_v59 = vpop.f32.mrf.mxu0 }
 0x158   :  { %v276_v61 = vrot.slane %v190_v59, %v271_v55  ;;  %v282_v62 = vadd.f32 %v280_v57, %v272_v58 }
 0x15a   :  { %v283_v63 = vadd.f32 %v280_v57, %v276_v61  ;;  %v284_v0 = vsub.f32 %v282_v62, %v263_v60 }
 0x15c   :  { %v286_v2 = vmax.f32 %v284_v0, 0.0  ;;  %v285_v3 = vsub.f32 %v283_v63, %v265_v1 }
 0x15e   :  { %314 = vrsqrt.f32 %v286_v2  ;;  %v287_v4 = vmax.f32 %v285_v3, 0.0  ;;  %vm290_vm1 = vcmp.eq.f32.partialorder %v286_v2, inf  ;;  %v293_v7 = vand.u32 2147483648, %v286_v2 }
 0x15f   :  { %vm292_vm2 = vcmp.eq.f32.partialorder %v286_v2, 0.0 }
 0x160   :  { %316 = vrsqrt.f32 %v287_v4  ;;  %vm297_vm3 = vcmp.eq.f32.partialorder %v287_v4, inf  ;;  %v300_v12 = vand.u32 2147483648, %v287_v4  ;;  %vm299_vm4 = vcmp.eq.f32.partialorder %v287_v4, 0.0 }
 0x16b   :  { %v315_v5 = vpop.eup %314 }
 0x16c   :  { %v289_v6 = vmul.f32 %v315_v5, %v286_v2 }
 0x16d   :  { %v317_v8 = vpop.eup %316 }
 0x16e   :  { %v291_v9 = vsel %vm290_vm1, %v286_v2, %v289_v6  ;;  %v296_v11 = vmul.f32 %v317_v8, %v287_v4 }
 0x16f   :  { %v294_v10 = vsel %vm292_vm2, %v293_v7, %v291_v9 }
 0x170   :  { %302 = vst [vmem:[%s452_s3] sm:$0xff] %v294_v10  ;;  %v298_v13 = vsel %vm297_vm3, %v287_v4, %v296_v11 }
 0x171   :  { %v301_v14 = vsel %vm299_vm4, %v300_v12, %v298_v13 }
 0x172   :  { %303 = vst [vmem:[%s452_s3 + $0x8] sm:$0xff] %v301_v14 }

</bundles_post_ra>
